<compile_context>
chip_gen: v6e
topology: v6e:2x2x1
jax: 0.10.0
libtpu: 0.0.40
codegen_flags: <defaults>
</compile_context>

<pallas_src>
import functools

import jax
import jax.numpy as jnp
from jax.experimental import pallas as pl
from jax.experimental.pallas import tpu as pltpu


def _leaky_relu(x, negative_slope=0.01):
    return jnp.where(x > 0, x, negative_slope * x)


def _round_up(n, m):
    return ((n + m - 1) // m) * m


def _mlp_kernel(x_ref,
                w1_ref, b1_ref,
                w2_ref, b2_ref,
                w3_ref, b3_ref,
                w4_ref, b4_ref,
                o_ref,
                *, compute_dtype):
    # x arrives in its HBM dtype (f32). Cast to the MXU feed dtype *inside* the
    # kernel (no-op for the f32 path) so the dominant x HBM stream is read once.
    x = x_ref[...].astype(compute_dtype)

    h = jnp.dot(x, w1_ref[...], preferred_element_type=jnp.float32) + b1_ref[...]
    h = _leaky_relu(h)                        # f32 elementwise (v5e-safe)
    # Dropout(0.25) -> identity at inference time.

    h = jnp.dot(h.astype(compute_dtype), w2_ref[...],
                preferred_element_type=jnp.float32) + b2_ref[...]
    h = _leaky_relu(h)

    h = jnp.dot(h.astype(compute_dtype), w3_ref[...],
                preferred_element_type=jnp.float32) + b3_ref[...]
    h = _leaky_relu(h)

    # Final Linear(f3 -> 1): VPU multiply + XLU lane-reduce.  The (block_b,)
    # column of per-row results is presented as a lane-dense (1, block_b) row so
    # the output store is an unmasked vst instead of a width-1 masked column.
    y = jnp.sum(h * w4_ref[...], axis=-1)                 # (block_b,)
    y_row = y.reshape(1, -1) + b4_ref[...]                # (1, block_b), f32
    o_ref[...] = y_row.reshape(1, 1, -1).astype(o_ref.dtype)


@functools.lru_cache(maxsize=None)
def _chip_config():
    """Returns (num_tensorcores, tile_budget_bytes, vmem_limit_bytes, mxu_rows)."""
    kind = ""
    try:
        dev = jax.devices()[0]
        if dev.platform == "tpu":
            kind = (getattr(dev, "device_kind", "") or "").lower()
    except Exception:  # be conservative if detection fails
        kind = ""
    if "v7" in kind or "tpu7" in kind:     # v7x: 2 TCs, 64 MiB VMEM/TC, 256-wide MXU
        return 2, 24 << 20, 48 << 20, 256
    if "v4" in kind or "v5p" in kind:      # megacore: 2 TCs, 128 MiB VMEM
        return 2, 40 << 20, 100 << 20, 128
    if "v6" in kind:                       # v6e: 1 TC, 128 MiB VMEM, 256-wide MXU
        return 1, 40 << 20, 100 << 20, 256
    if "v5" in kind:                       # v5e: 1 TC, 128 MiB VMEM
        return 1, 40 << 20, 100 << 20, 128
    return 1, 12 << 20, 32 << 20, 128      # unknown: conservative defaults


def _auto_block_b(batch, feat, dims, x_itemsize, w_itemsize,
                  budget_bytes, num_cores, mxu_rows):
    """Generation-aware batch-tile sizing with lane-padded VMEM accounting."""
    sub = 8
    f1, f2, f3 = dims
    pad_l = lambda n: _round_up(max(n, 1), 128)   # lane padding
    pad_s = lambda n: _round_up(max(n, 1), sub)   # sublane padding

    # Fixed VMEM: weights/biases (double-buffered by Pallas even though their
    # constant index_maps mean they are DMA'd only once).
    fixed = 2 * w_itemsize * (pad_s(feat) * pad_l(f1)
                              + pad_s(f1) * pad_l(f2)
                              + pad_s(f2) * pad_l(f3))
    fixed += 2 * 4 * (pad_l(f1) + pad_l(f2) + 2 * pad_l(f3) + 128)

    # Per-batch-row VMEM: double-buffered, lane-padded x tile + f32 intermediates
    # (h1/h2/h3 + compute-dtype copies) + the lane-row output.
    per_row = 2 * pad_l(feat) * x_itemsize
    per_row += 2 * 4 * (pad_l(f1) + pad_l(f2) + pad_l(f3))
    per_row += 2 * 4

    avail = max(budget_bytes - fixed, per_row * sub)
    bb = avail // per_row

    # Keep the per-tile x DMA near the measured 2-4 MiB pipelining sweet spot.
    x_tile_cap = (4 << 20) // max(pad_l(feat) * x_itemsize, 1)
    bb = min(bb, max(x_tile_cap, mxu_rows))

    # Fill the MXU M dimension when the batch allows (free to enforce).
    bb = max(bb, min(mxu_rows, _round_up(batch, sub)))

    # Dual-TC chips (v4/v5p/v7x): >=2 grid steps per core so each core still
    # overlaps its x DMA with compute.  Single-TC chips get one maximal tile.
    if num_cores > 1:
        min_steps = 2 * num_cores
        if batch >= min_steps * sub:
            bb = min(bb, -(-batch // min_steps))

    bb = min(bb, _round_up(batch, sub))           # never exceed (rounded) B
    bb = max(sub, (bb // sub) * sub)              # sublane multiple, >= 8
    return int(bb)


@functools.partial(jax.jit, static_argnums=(2, 3, 4))
def _forward_jit(x, params, block_b, use_bf16, vmem_limit_bytes):
    B, F = x.shape
    compute_dtype = jnp.bfloat16 if use_bf16 else x.dtype

    # Only the (tiny) weights are cast in the wrapper; x is NOT — the kernel
    # casts the tile in VMEM, keeping the dominant x HBM stream a single read.
    w1 = params["w1"].astype(compute_dtype)
    w2 = params["w2"].astype(compute_dtype)
    w3 = params["w3"].astype(compute_dtype)
    w4 = params["w4"].astype(jnp.float32)     # used on the VPU -> keep f32
    b1 = params["b1"].astype(jnp.float32)
    b2 = params["b2"].astype(jnp.float32)
    b3 = params["b3"].astype(jnp.float32)
    b4 = params["b4"].astype(jnp.float32)

    f1, f2, f3 = w1.shape[1], w2.shape[1], w3.shape[1]
    num_tiles = pl.cdiv(B, block_b)

    def rep(shape):
        # Constant index_map: Pallas DMAs this block once and revisits it.
        return pl.BlockSpec(shape, lambda i, _n=len(shape): (0,) * _n)

    w_itemsize = jnp.dtype(compute_dtype).itemsize
    flops = 2 * B * (F * f1 + f1 * f2 + f2 * f3 + f3)
    bytes_accessed = (B * F * x.dtype.itemsize                       # x (f32)
                      + (F * f1 + f1 * f2 + f2 * f3) * w_itemsize    # MXU weights
                      + (f1 + f2 + f3 + f3 + 1) * 4                  # biases + w4 row
                      + num_tiles * block_b * x.dtype.itemsize)      # output
    cost = pl.CostEstimate(flops=flops, transcendentals=0,
                           bytes_accessed=bytes_accessed)

    out = pl.pallas_call(
        functools.partial(_mlp_kernel, compute_dtype=compute_dtype),
        out_shape=jax.ShapeDtypeStruct((num_tiles, 1, block_b), x.dtype),
        grid_spec=pltpu.PrefetchScalarGridSpec(
            num_scalar_prefetch=0,
            grid=(num_tiles,),
            in_specs=[
                pl.BlockSpec((block_b, F), lambda i: (i, 0)),   # x batch tile (f32)
                rep(w1.shape), rep(b1.shape),
                rep(w2.shape), rep(b2.shape),
                rep(w3.shape), rep(b3.shape),
                rep(w4.shape), rep(b4.shape),
            ],
            out_specs=pl.BlockSpec((1, 1, block_b), lambda i: (i, 0, 0)),
        ),
        compiler_params=pltpu.CompilerParams(
            dimension_semantics=("parallel",),
            vmem_limit_bytes=vmem_limit_bytes),
        cost_estimate=cost,
    )(x, w1, b1, w2, b2, w3, b3, w4, b4)

    # Lane-dense (num_tiles, 1, block_b) rows -> (B, 1) column, dropping padding rows.
    return out.reshape(num_tiles * block_b)[:B].reshape(B, 1)


def speech_discriminator_forward(x, params, block_b=None, use_bf16=False):
    """Fused forward pass.  x: (B, F) float32.  params: w1..w3 transposed (in, out),
    w4 as a (1, f3) lane row, biases as (1, out) rows.  GradientReversal is identity
    in the forward pass.  use_bf16 feeds the MXU in bf16 (in-kernel cast, f32 accum)."""
    B, F = x.shape
    num_cores, budget, vmem_limit, mxu_rows = _chip_config()
    compute_dtype = jnp.bfloat16 if use_bf16 else x.dtype
    f1, f2, f3 = params["w1"].shape[1], params["w2"].shape[1], params["w3"].shape[1]
    if block_b is None:
        block_b = _auto_block_b(B, F, (f1, f2, f3),
                                jnp.dtype(x.dtype).itemsize,
                                jnp.dtype(compute_dtype).itemsize,
                                budget, num_cores, mxu_rows)
    return _forward_jit(x, params, int(block_b), bool(use_bf16), int(vmem_limit))


def init_params(features_length, key):
    """Deterministic PyTorch-Linear-style init (uniform +/- 1/sqrt(fan_in)).
    w1..w3 stored transposed (in, out); w4 stored as a (1, f3) row."""
    dims = [
        features_length,
        int(features_length * 0.75),
        int(features_length * 0.5),
        int(features_length * 0.25),
        1,
    ]
    params = {}
    keys = jax.random.split(key, 8)
    for idx in range(4):
        fan_in, fan_out = dims[idx], dims[idx + 1]
        bound = 1.0 / (fan_in ** 0.5)
        if idx < 3:
            w_shape = (fan_in, fan_out)          # (in, out)
        else:
            w_shape = (1, fan_in)                # final layer kept as a lane row
        w = jax.random.uniform(keys[2 * idx], w_shape,
                               minval=-bound, maxval=bound, dtype=jnp.float32)
        b = jax.random.uniform(keys[2 * idx + 1], (1, fan_out),
                               minval=-bound, maxval=bound, dtype=jnp.float32)
        params[f"w{idx + 1}"] = w
        params[f"b{idx + 1}"] = b
    return params


def reference_forward(x, params):
    """Pure-JAX reference (same eval-mode semantics)."""
    h = x @ params["w1"] + params["b1"]
    h = _leaky_relu(h)
    h = h @ params["w2"] + params["b2"]
    h = _leaky_relu(h)
    h = h @ params["w3"] + params["b3"]
    h = _leaky_relu(h)
    return jnp.sum(h * params["w4"], axis=-1, keepdims=True) + params["b4"]


if __name__ == "__main__":
    features_length = 32
    batch = 32

    key = jax.random.PRNGKey(0)
    k_x, k_p = jax.random.split(key)

    x = jax.random.normal(k_x, (batch, features_length), dtype=jnp.float32)
    params = init_params(features_length, k_p)

    y_ref = reference_forward(x, params)

    # f32 path.  Tolerance allows for TPU default (reduced-precision) f32 matmuls
    # in the XLA reference vs the in-kernel MXU path.
    y = jax.block_until_ready(speech_discriminator_forward(x, params))
    assert y.shape == (batch, 1), y.shape
    assert jnp.allclose(y, y_ref, atol=2e-2, rtol=2e-2), "f32 mismatch vs reference"

    # bf16-fed MXU path (in-kernel cast; halves weight traffic, x stream unchanged).
    y_bf16 = jax.block_until_ready(
        speech_discriminator_forward(x, params, use_bf16=True))
    assert y_bf16.shape == (batch, 1), y_bf16.shape
    assert bool(jnp.all(jnp.isfinite(y_bf16)))
    assert jnp.allclose(y_bf16, y_ref, atol=1e-1, rtol=1e-1), "bf16 mismatch vs reference"

    print("KERNEL_OK")
</pallas_src>

<mosaic_0001>
module attributes {stable_mosaic.version = 11 : i64} {
  func.func @_mlp_kernel(%arg0: i32, %arg1: memref<32x32xf32, #tpu.memory_space<vmem>>, %arg2: memref<32x24xf32, #tpu.memory_space<vmem>>, %arg3: memref<1x24xf32, #tpu.memory_space<vmem>>, %arg4: memref<24x16xf32, #tpu.memory_space<vmem>>, %arg5: memref<1x16xf32, #tpu.memory_space<vmem>>, %arg6: memref<16x8xf32, #tpu.memory_space<vmem>>, %arg7: memref<1x8xf32, #tpu.memory_space<vmem>>, %arg8: memref<1x8xf32, #tpu.memory_space<vmem>>, %arg9: memref<1x1xf32, #tpu.memory_space<vmem>>, %arg10: memref<1x1x32xf32, #tpu.memory_space<vmem>>) attributes {dimension_semantics = [#tpu.dimension_semantics<parallel>], iteration_bounds = array<i64: 1>, scalar_prefetch = 0 : i64, scratch_operands = 0 : i64, tpu.core_type = #tpu.core_type<tc>, window_params = [{transform_indices = @transform_0, window_bounds = array<i64: 32, 32>}, {pipeline_mode = #tpu.pipeline_mode<synchronous>, transform_indices = @transform_1, window_bounds = array<i64: 32, 24>}, {pipeline_mode = #tpu.pipeline_mode<synchronous>, transform_indices = @transform_2, window_bounds = array<i64: 1, 24>}, {pipeline_mode = #tpu.pipeline_mode<synchronous>, transform_indices = @transform_3, window_bounds = array<i64: 24, 16>}, {pipeline_mode = #tpu.pipeline_mode<synchronous>, transform_indices = @transform_4, window_bounds = array<i64: 1, 16>}, {pipeline_mode = #tpu.pipeline_mode<synchronous>, transform_indices = @transform_5, window_bounds = array<i64: 16, 8>}, {pipeline_mode = #tpu.pipeline_mode<synchronous>, transform_indices = @transform_6, window_bounds = array<i64: 1, 8>}, {pipeline_mode = #tpu.pipeline_mode<synchronous>, transform_indices = @transform_7, window_bounds = array<i64: 1, 8>}, {pipeline_mode = #tpu.pipeline_mode<synchronous>, transform_indices = @transform_8, window_bounds = array<i64: 1, 1>}, {transform_indices = @transform_9, window_bounds = array<i64: 1, 1, 32>}]} {
    %c0 = arith.constant 0 : index
    %c0_0 = arith.constant 0 : index
    %0 = vector.load %arg1[%c0, %c0_0] : memref<32x32xf32, #tpu.memory_space<vmem>>, vector<32x32xf32>
    %c0_1 = arith.constant 0 : index
    %c0_2 = arith.constant 0 : index
    %1 = vector.load %arg2[%c0_1, %c0_2] : memref<32x24xf32, #tpu.memory_space<vmem>>, vector<32x24xf32>
    %cst = arith.constant dense<0.000000e+00> : vector<32x24xf32>
    %2 = tpu.matmul %0, %1, %cst {dimension_numbers = #tpu.dot_dimension_numbers<[1], [0], [0], [1], [0, 0, 1, 1], [], []>} : vector<32x32xf32>, vector<32x24xf32>, vector<32x24xf32> -> vector<32x24xf32>
    %c0_3 = arith.constant 0 : index
    %c0_4 = arith.constant 0 : index
    %3 = vector.load %arg3[%c0_3, %c0_4] : memref<1x24xf32, #tpu.memory_space<vmem>>, vector<1x24xf32>
    %4 = vector.broadcast %3 : vector<1x24xf32> to vector<32x24xf32>
    %5 = arith.addf %2, %4 : vector<32x24xf32>
    %cst_5 = arith.constant 0.000000e+00 : f32
    %6 = vector.broadcast %cst_5 : f32 to vector<32x24xf32>
    %7 = arith.cmpf ogt, %5, %6 : vector<32x24xf32>
    %cst_6 = arith.constant 0.00999999977 : f32
    %8 = vector.broadcast %cst_6 : f32 to vector<32x24xf32>
    %9 = arith.mulf %8, %5 : vector<32x24xf32>
    %10 = arith.select %7, %5, %9 : vector<32x24xi1>, vector<32x24xf32>
    %c0_7 = arith.constant 0 : index
    %c0_8 = arith.constant 0 : index
    %11 = vector.load %arg4[%c0_7, %c0_8] : memref<24x16xf32, #tpu.memory_space<vmem>>, vector<24x16xf32>
    %cst_9 = arith.constant dense<0.000000e+00> : vector<32x16xf32>
    %12 = tpu.matmul %10, %11, %cst_9 {dimension_numbers = #tpu.dot_dimension_numbers<[1], [0], [0], [1], [0, 0, 1, 1], [], []>} : vector<32x24xf32>, vector<24x16xf32>, vector<32x16xf32> -> vector<32x16xf32>
    %c0_10 = arith.constant 0 : index
    %c0_11 = arith.constant 0 : index
    %13 = vector.load %arg5[%c0_10, %c0_11] : memref<1x16xf32, #tpu.memory_space<vmem>>, vector<1x16xf32>
    %14 = vector.broadcast %13 : vector<1x16xf32> to vector<32x16xf32>
    %15 = arith.addf %12, %14 : vector<32x16xf32>
    %cst_12 = arith.constant 0.000000e+00 : f32
    %16 = vector.broadcast %cst_12 : f32 to vector<32x16xf32>
    %17 = arith.cmpf ogt, %15, %16 : vector<32x16xf32>
    %cst_13 = arith.constant 0.00999999977 : f32
    %18 = vector.broadcast %cst_13 : f32 to vector<32x16xf32>
    %19 = arith.mulf %18, %15 : vector<32x16xf32>
    %20 = arith.select %17, %15, %19 : vector<32x16xi1>, vector<32x16xf32>
    %c0_14 = arith.constant 0 : index
    %c0_15 = arith.constant 0 : index
    %21 = vector.load %arg6[%c0_14, %c0_15] : memref<16x8xf32, #tpu.memory_space<vmem>>, vector<16x8xf32>
    %cst_16 = arith.constant dense<0.000000e+00> : vector<32x8xf32>
    %22 = tpu.matmul %20, %21, %cst_16 {dimension_numbers = #tpu.dot_dimension_numbers<[1], [0], [0], [1], [0, 0, 1, 1], [], []>} : vector<32x16xf32>, vector<16x8xf32>, vector<32x8xf32> -> vector<32x8xf32>
    %c0_17 = arith.constant 0 : index
    %c0_18 = arith.constant 0 : index
    %23 = vector.load %arg7[%c0_17, %c0_18] : memref<1x8xf32, #tpu.memory_space<vmem>>, vector<1x8xf32>
    %24 = vector.broadcast %23 : vector<1x8xf32> to vector<32x8xf32>
    %25 = arith.addf %22, %24 : vector<32x8xf32>
    %cst_19 = arith.constant 0.000000e+00 : f32
    %26 = vector.broadcast %cst_19 : f32 to vector<32x8xf32>
    %27 = arith.cmpf ogt, %25, %26 : vector<32x8xf32>
    %cst_20 = arith.constant 0.00999999977 : f32
    %28 = vector.broadcast %cst_20 : f32 to vector<32x8xf32>
    %29 = arith.mulf %28, %25 : vector<32x8xf32>
    %30 = arith.select %27, %25, %29 : vector<32x8xi1>, vector<32x8xf32>
    %c0_21 = arith.constant 0 : index
    %c0_22 = arith.constant 0 : index
    %31 = vector.load %arg8[%c0_21, %c0_22] : memref<1x8xf32, #tpu.memory_space<vmem>>, vector<1x8xf32>
    %32 = vector.broadcast %31 : vector<1x8xf32> to vector<32x8xf32>
    %33 = arith.mulf %30, %32 : vector<32x8xf32>
    %cst_23 = arith.constant dense<0.000000e+00> : vector<32xf32>
    %34 = vector.multi_reduction <add>, %33, %cst_23 [1] : vector<32x8xf32> to vector<32xf32>
    %35 = vector.shape_cast %34 : vector<32xf32> to vector<1x32xf32>
    %c0_24 = arith.constant 0 : index
    %c0_25 = arith.constant 0 : index
    %36 = vector.load %arg9[%c0_24, %c0_25] : memref<1x1xf32, #tpu.memory_space<vmem>>, vector<1x1xf32>
    %37 = vector.broadcast %36 : vector<1x1xf32> to vector<1x32xf32>
    %38 = arith.addf %35, %37 : vector<1x32xf32>
    %39 = vector.shape_cast %38 : vector<1x32xf32> to vector<1x1x32xf32>
    %c0_26 = arith.constant 0 : index
    %c0_27 = arith.constant 0 : index
    %c0_28 = arith.constant 0 : index
    %40 = vector.load %arg10[%c0_26, %c0_27, %c0_28] : memref<1x1x32xf32, #tpu.memory_space<vmem>>, vector<1x1x32xf32>
    tpu.vector_store %arg10[%c0_26, %c0_27, %c0_28], %39 {strides = array<i32>} : memref<1x1x32xf32, #tpu.memory_space<vmem>>, vector<1x1x32xf32>,
    return
  }
  func.func @transform_0(%arg0: i32) -> (i32, i32) {
    %c0_i32 = arith.constant 0 : i32
    %c0_i32_0 = arith.constant 0 : i32
    return %arg0, %c0_i32 : i32, i32
  }
  func.func @transform_1(%arg0: i32) -> (i32, i32) {
    %c0_i32 = arith.constant 0 : i32
    %c0_i32_0 = arith.constant 0 : i32
    %c0_i32_1 = arith.constant 0 : i32
    return %c0_i32, %c0_i32_0 : i32, i32
  }
  func.func @transform_2(%arg0: i32) -> (i32, i32) {
    %c0_i32 = arith.constant 0 : i32
    %c0_i32_0 = arith.constant 0 : i32
    %c0_i32_1 = arith.constant 0 : i32
    return %c0_i32, %c0_i32_0 : i32, i32
  }
  func.func @transform_3(%arg0: i32) -> (i32, i32) {
    %c0_i32 = arith.constant 0 : i32
    %c0_i32_0 = arith.constant 0 : i32
    %c0_i32_1 = arith.constant 0 : i32
    return %c0_i32, %c0_i32_0 : i32, i32
  }
  func.func @transform_4(%arg0: i32) -> (i32, i32) {
    %c0_i32 = arith.constant 0 : i32
    %c0_i32_0 = arith.constant 0 : i32
    %c0_i32_1 = arith.constant 0 : i32
    return %c0_i32, %c0_i32_0 : i32, i32
  }
  func.func @transform_5(%arg0: i32) -> (i32, i32) {
    %c0_i32 = arith.constant 0 : i32
    %c0_i32_0 = arith.constant 0 : i32
    %c0_i32_1 = arith.constant 0 : i32
    return %c0_i32, %c0_i32_0 : i32, i32
  }
  func.func @transform_6(%arg0: i32) -> (i32, i32) {
    %c0_i32 = arith.constant 0 : i32
    %c0_i32_0 = arith.constant 0 : i32
    %c0_i32_1 = arith.constant 0 : i32
    return %c0_i32, %c0_i32_0 : i32, i32
  }
  func.func @transform_7(%arg0: i32) -> (i32, i32) {
    %c0_i32 = arith.constant 0 : i32
    %c0_i32_0 = arith.constant 0 : i32
    %c0_i32_1 = arith.constant 0 : i32
    return %c0_i32, %c0_i32_0 : i32, i32
  }
  func.func @transform_8(%arg0: i32) -> (i32, i32) {
    %c0_i32 = arith.constant 0 : i32
    %c0_i32_0 = arith.constant 0 : i32
    %c0_i32_1 = arith.constant 0 : i32
    return %c0_i32, %c0_i32_0 : i32, i32
  }
  func.func @transform_9(%arg0: i32) -> (i32, i32, i32) {
    %c0_i32 = arith.constant 0 : i32
    %c0_i32_0 = arith.constant 0 : i32
    %c0_i32_1 = arith.constant 0 : i32
    return %arg0, %c0_i32, %c0_i32_0 : i32, i32, i32
  }
}

</mosaic_0001>

<bundles_post_ra>
// kernel: _forward_jit.1
= control target key start
LH: loop header
LB: loop body
LE: loop exit
PB: predicated region body
PF: predicated region fallthrough
CT: control target
= control target key end

     0   :  { %s714_s0 = inlined_call_operand.vmem [shape: f32[32,32], index: 0, kind: input, shape index: {}]   ;;  %s715_s1 = inlined_call_operand.vmem [shape: f32[32,24], index: 1, kind: input, shape index: {}]   ;;  %s716_s2 = inlined_call_operand.vmem [shape: f32[1,24], index: 2, kind: input, shape index: {}]   ;;  %s717_s3 = inlined_call_operand.vmem [shape: f32[24,16], index: 3, kind: input, shape index: {}]   ;;  %s718_s4 = inlined_call_operand.vmem [shape: f32[1,16], index: 4, kind: input, shape index: {}]   ;;  %s719_s5 = inlined_call_operand.vmem [shape: f32[16,8], index: 5, kind: input, shape index: {}]   ;;  %s720_s6 = inlined_call_operand.vmem [shape: f32[1,8], index: 6, kind: input, shape index: {}]   ;;  %s721_s7 = inlined_call_operand.vmem [shape: f32[1,8], index: 7, kind: input, shape index: {}]   ;;  %s722_s8 = inlined_call_operand.<no memory space> [shape: f32[1,1], index: 8, kind: input, shape index: {}]   ;;  %s723_s9 = inlined_call_operand.hbm [shape: f32[1,1,32], index: 9, kind: output, shape index: {}]  }
   0x1   :  { %v14_v0 = vstv %s722_s8 }
   0x2   :  { %15 = vst [vmem:[#allocation2] sm:$0x1] %v14_v0 }
   0x3   :  { %v42_v1 = vld [vmem:[%s715_s1 + $0x18] sm:$0xff]  ;;  %v41_v2 = vld [vmem:[%s715_s1 + $0x10] sm:$0xff]  ;;  %vm50_vm0 = vcmask 261120   ;;  %v35_v3 = vld [vmem:[%s714_s0] sm:$0xff] }
   0x4   :  { %522 = vmatprep.subr.mxu0 %v42_v1  ;;  %v40_v4 = vld [vmem:[%s715_s1 + $0x8] sm:$0xff]  ;;  %530 = vmatprep.mubr.msk.f32.mxu0 %vm50_vm0, %v35_v3 }
   0x5   :  { %523 = vmatpush3.msra.mxu0 %v42_v1 }
   0x6   :  { %16 = vsyncpa [#allocation4], 0  ;;  %524 = vmatprep.subr.mxu0 %v41_v2  ;;  %v39_v5 = vld [vmem:[%s715_s1] sm:$0xff]  ;;  %v36_v6 = vld [vmem:[%s714_s0 + $0x8] sm:$0xff]  ;;  %vm170_vm1 = vcmask 195584   ;;  %vm289_vm6 = vcmask 130048  }
   0x7   :  { %525 = vmatpush3.msra.mxu0 %v41_v2  ;;  %v37_v7 = vld [vmem:[%s714_s0 + $0x10] sm:$0xff]  ;;  %v38_v8 = vld [vmem:[%s714_s0 + $0x18] sm:$0xff]  ;;  %v161_v10 = vld [vmem:[%s717_s3 + $0x8] sm:$0xff]  ;;  %v589_v48 = vmov 0   ;;  %vm410_vm12 = vcmask 64512  }
   0x8   :  { %526 = vmatprep.subr.mxu0 %v40_v4  ;;  %v162_v9 = vld [vmem:[%s717_s3 + $0x10] sm:$0xff]  ;;  %v160_v11 = vld [vmem:[%s717_s3] sm:$0xff]  ;;  %v281_v29 = vld [vmem:[%s719_s5 + $0x8] sm:$0xff]  ;;  %566 = vset.pattern.permute.xlu0 %v589_v48 }
   0x9   :  { %527 = vmatpush3.msra.mxu0 %v40_v4  ;;  %558 = vmatprep.subr.mxu1 %v162_v9  ;;  %v485_v12 = vld [vmem:[%s716_s2] ss:$0 sm:$0xff] }
   0xa   :  { %528 = vmatprep.subr.mxu0 %v39_v5  ;;  %561 = vmatpush3.msra.mxu1 %v162_v9  ;;  %v280_v30 = vld [vmem:[%s719_s5] sm:$0xff] }
   0xb   :  { %529 = vmatpush3.msra.mxu0 %v39_v5  ;;  %559 = vmatprep.subr.mxu1 %v161_v10  ;;  %v490_v31 = vld [vmem:[%s718_s4] ss:$0 sm:$0xff] }
   0xc   :  { %531 = vmatmul.mubr.msk.f32.vlgmr.msra.gmra.mxu0 %vm50_vm0, %v36_v6  ;;  %536 = vmatprep.subr.mxu0 %v162_v9  ;;  %v495_v49 = vld [vmem:[%s720_s6] ss:$0 sm:$0xff]  ;;  %s590_s6 = smov [#allocation3]  }
   0xd   :  { %533 = vmatprep.mubr.msk.f32.mxu0 %vm50_vm0, %v37_v7  ;;  %537 = vmatpush3.msra.mxu0 %v162_v9  ;;  %v500_v55 = vld [vmem:[%s721_s7] ss:$0 sm:$0xff]  ;;  %s477_s7 = sshll.u32 %s590_s6, 4  ;;  %s478_s7 = int_to_ptr.vmem [resolvable:$true] %s477_s7 }
   0xe   :  { %538 = vmatprep.subr.mxu0 %v161_v10  ;;  %562 = vmatpush3.msra.mxu1 %v161_v10  ;;  %s567_s17 = scalar_lea.vmem %s478_s7, 16  ;;  %s571_s18 = scalar_lea.vmem %s478_s7, 32 }
   0xf   :  { %539 = vmatpush3.msra.mxu0 %v161_v10  ;;  %560 = vmatprep.subr.mxu1 %v160_v11  ;;  %p568_p0 = scmp.ne.s32.totalorder %s478_s7, %s567_s17  ;;  %p572_p1 = scmp.lt.s32.totalorder %s478_s7, %s478_s7 }
  0x10   :  { %534 = vmatmul.mubr.msk.f32.gmra.mxu0 %vm50_vm0, %v38_v8  ;;  %540 = vmatprep.subr.mxu0 %v160_v11  ;;  %vm452_vm0 = vcmask 130112   ;;  %p573_p2 = scmp.lt.s32.totalorder %s571_s18, %s567_s17 }
  0x11   :  { %541 = vmatpush3.msra.mxu0 %v160_v11  ;;  %563 = vmatpush3.msra.mxu1 %v160_v11  ;;  %v423_v11 = vld [vmem:[#allocation2] sm:$0x1] }
  0x12   :  { %548 = vmatprep.subr.mxu1 %v281_v29  ;;  %p574_p3 = por %p573_p2, %p572_p1 }
  0x14   :  { %p575_p4 = pnand %p574_p3, %p568_p0 }
  0xcc   :  { %v532_v13 = vpop.f32.mrf.mxu0 }
  0xcd   :  { %v135_v14 = vadd.f32 %v532_v13, %v485_v12 }
  0xce   :  { %v129_v15 = vpop.f32.mrf.mxu0 }
  0xcf   :  { %v130_v16 = vadd.f32 %v485_v12, %v129_v15  ;;  %v153_v17 = vmul.f32 0.01, %v135_v14  ;;  %vm149_vm2 = vcmp.gt.f32.partialorder %v135_v14, 0.0 }
  0xd0   :  { %v535_v18 = vpop.f32.mrf.mxu0 }
  0xd1   :  { %vm148_vm3 = vcmp.gt.f32.partialorder %v130_v16, 0.0  ;;  %v152_v19 = vmul.f32 0.01, %v130_v16  ;;  %v145_v20 = vadd.f32 %v535_v18, %v485_v12  ;;  %v157_v25 = vsel %vm149_vm2, %v135_v14, %v153_v17 }
  0xd2   :  { %v139_v21 = vpop.f32.mrf.mxu0  ;;  %vm466_vm2 = vcmask 261312  }
  0xd3   :  { %vm151_vm4 = vcmp.gt.f32.partialorder %v145_v20, 0.0  ;;  %v155_v22 = vmul.f32 0.01, %v145_v20  ;;  %v140_v23 = vadd.f32 %v485_v12, %v139_v21  ;;  %v156_v24 = vsel %vm148_vm3, %v130_v16, %v152_v19 }
  0xd4   :  { %542 = vmatprep.mubr.msk.f32.mxu0 %vm170_vm1, %v156_v24  ;;  %v429_v12 = vlaneseq  ;;  %vm469_vm3 = vcmask 253952  }
  0xd5   :  { %543 = vmatmul.mubr.msk.f32.vlgmr.msra.gmra.mxu0 %vm170_vm1, %v157_v25  ;;  %vm150_vm5 = vcmp.gt.f32.partialorder %v140_v23, 0.0  ;;  %v154_v26 = vmul.f32 0.01, %v140_v23  ;;  %v159_v27 = vsel %vm151_vm4, %v145_v20, %v155_v22 }
  0xd6   :  { %v430_v14 = vshrl.u32 %v429_v12, 7  ;;  %v442_v15 = vand.u32 127, %v429_v12 }
  0xd7   :  { %v158_v28 = vsel %vm150_vm5, %v140_v23, %v154_v26 }
  0xd8   :  { %545 = vmatprep.mubr.msk.f32.mxu1 %vm170_vm1, %v158_v28  ;;  %v431_v18 = vsub.s32 0, %v430_v14  ;;  %v447_v19 = vadd.s32 4294967288, %v442_v15  ;;  %v454_v20 = vadd.s32 4294967280, %v442_v15  ;;  %v461_v21 = vadd.s32 4294967272, %v442_v15 }
  0xd9   :  { %546 = vmatmul.mubr.msk.f32.vlgmr.msra.gmra.mxu1 %vm170_vm1, %v159_v27  ;;  %v445_v23 = vsub.s32 %v442_v15, %v430_v14  ;;  %vm459_vm1 = vcmask 195712  }
  0xda   :  { %549 = vmatpush3.msra.mxu1 %v281_v29  ;;  %v450_v24 = vsub.s32 %v447_v19, %v430_v14  ;;  %v457_v26 = vsub.s32 %v454_v20, %v430_v14  ;;  %v464_v28 = vsub.s32 %v461_v21, %v430_v14 }
  0xdb   :  { %550 = vmatprep.subr.mxu1 %v280_v30 }
  0xdc   :  { %551 = vmatpush3.msra.mxu1 %v280_v30 }
 0x195   :  { %v544_v32 = vpop.f32.mrf.mxu0 }
 0x196   :  { %v255_v33 = vadd.f32 %v544_v32, %v490_v31 }
 0x197   :  { %v249_v34 = vpop.f32.mrf.mxu0 }
 0x198   :  { %v250_v35 = vadd.f32 %v490_v31, %v249_v34  ;;  %v273_v36 = vmul.f32 0.01, %v255_v33  ;;  %vm269_vm7 = vcmp.gt.f32.partialorder %v255_v33, 0.0 }
 0x199   :  { %v547_v37 = vpop.f32.mrf.mxu1 }
 0x19a   :  { %vm268_vm8 = vcmp.gt.f32.partialorder %v250_v35, 0.0  ;;  %v272_v38 = vmul.f32 0.01, %v250_v35  ;;  %v265_v39 = vadd.f32 %v547_v37, %v490_v31  ;;  %v277_v43 = vsel %vm269_vm7, %v255_v33, %v273_v36 }
 0x19b   :  { %v259_v40 = vpop.f32.mrf.mxu1 }
 0x19c   :  { %v260_v41 = vadd.f32 %v490_v31, %v259_v40  ;;  %v276_v42 = vsel %vm268_vm8, %v250_v35, %v272_v38  ;;  %v275_v44 = vmul.f32 0.01, %v265_v39  ;;  %vm271_vm9 = vcmp.gt.f32.partialorder %v265_v39, 0.0 }
 0x19d   :  { %552 = vmatprep.mubr.msk.f32.mxu1 %vm289_vm6, %v276_v42 }
 0x19e   :  { %vm270_vm10 = vcmp.gt.f32.partialorder %v260_v41, 0.0  ;;  %v274_v45 = vmul.f32 0.01, %v260_v41  ;;  %553 = vmatmul.mubr.msk.f32.vlgmr.msra.gmra.mxu1 %vm289_vm6, %v277_v43  ;;  %v279_v47 = vsel %vm271_vm9, %v265_v39, %v275_v44 }
 0x1a0   :  { %v278_v46 = vsel %vm270_vm10, %v260_v41, %v274_v45 }
 0x1a1   :  { %555 = vmatprep.mubr.msk.f32.mxu1 %vm289_vm6, %v278_v46 }
 0x1a2   :  { %556 = vmatmul.mubr.msk.f32.gmra.mxu1 %vm289_vm6, %v279_v47 }
 0x25e   :  { %v554_v50 = vpop.f32.mrf.mxu1 }
 0x25f   :  { %v374_v51 = vadd.f32 %v554_v50, %v495_v49 }
 0x260   :  { %v368_v52 = vpop.f32.mrf.mxu1 }
 0x261   :  { %v392_v53 = vmul.f32 0.01, %v374_v51  ;;  %v369_v54 = vadd.f32 %v495_v49, %v368_v52  ;;  %vm388_vm11 = vcmp.gt.f32.partialorder %v374_v51, 0.0 }
 0x262   :  { %v557_v56 = vpop.f32.mrf.mxu1 }
 0x263   :  { %vm387_vm13 = vcmp.gt.f32.partialorder %v369_v54, 0.0  ;;  %v391_v57 = vmul.f32 0.01, %v369_v54  ;;  %v384_v58 = vadd.f32 %v557_v56, %v495_v49  ;;  %v396_v59 = vsel %vm388_vm11, %v374_v51, %v392_v53 }
 0x264   :  { %v378_v60 = vpop.f32.mrf.mxu1  ;;  %v407_v61 = vmul.f32 %v500_v55, %v396_v59 }
 0x265   :  { %v394_v62 = vmul.f32 0.01, %v384_v58  ;;  %v379_v63 = vadd.f32 %v495_v49, %v378_v60  ;;  %v395_v0 = vsel %vm387_vm13, %v369_v54, %v391_v57  ;;  %vm390_vm14 = vcmp.gt.f32.partialorder %v384_v58, 0.0 }
 0x266   :  { %v414_v1 = vsel %vm410_vm12, %v407_v61, 0.0  ;;  %v406_v2 = vmul.f32 %v500_v55, %v395_v0 }
 0x267   :  { %v393_v3 = vmul.f32 0.01, %v379_v63  ;;  %415 = vadd.xlane.f32.xlu0 %v414_v1  ;;  %vm389_vm15 = vcmp.gt.f32.partialorder %v379_v63, 0.0  ;;  %v398_v5 = vsel %vm390_vm14, %v384_v58, %v394_v62 }
 0x268   :  { %v411_v6 = vsel %vm410_vm12, %v406_v2, 0.0  ;;  %v409_v9 = vmul.f32 %v500_v55, %v398_v5 }
 0x269   :  { %v397_v4 = vsel %vm389_vm15, %v379_v63, %v393_v3 }
 0x26a   :  { %v408_v7 = vmul.f32 %v500_v55, %v397_v4  ;;  %v420_v10 = vsel %vm410_vm12, %v409_v9, 0.0 }
 0x26b   :  { %412 = vadd.xlane.f32.xlu0 %v411_v6 }
 0x26c   :  { %v417_v8 = vsel %vm410_vm12, %v408_v7, 0.0 }
 0x26d   :  { %418 = vadd.xlane.f32.xlu1 %v417_v8 }
 0x271   :  { %421 = vadd.xlane.f32.xlu1 %v420_v10 }
 0x281   :  { %426 = vperm.xlu0 %566, %v423_v11  }
 0x2f0   :  { %v416_v13 = vpop.xlane.xlu0 %415 }
 0x2f4   :  { %v413_v16 = vpop.xlane.xlu0 %412 }
 0x2f6   :  { %v419_v17 = vpop.xlane.xlu1 %418 }
 0x2fa   :  { %v422_v27 = vpop.xlane.xlu1 %421 }
 0x2fc   :  { %v427_v22 = vpop.permute.xlu0 %426 }
 0x2fd   :  { %v432_v25 = vrot.slane %v427_v22, %v431_v18 }
 0x2ff   :  { %v433_v29 = vadd.f32 %v432_v25, %v413_v16  ;;  %v434_v30 = vadd.f32 %v432_v25, %v416_v13  ;;  %v435_v31 = vadd.f32 %v432_v25, %v419_v17  ;;  %v436_v32 = vadd.f32 %v432_v25, %v422_v27 }
 0x301   :  { %v446_v33 = vrot.slane %v433_v29, %v445_v23  ;;  %v451_v34 = vrot.slane %v434_v30, %v450_v24  ;;  %v458_v35 = vrot.slane %v435_v31, %v457_v26  ;;  %v465_v37 = vrot.slane %v436_v32, %v464_v28 }
 0x303   :  { %v453_v36 = vsel %vm452_vm0, %v451_v34, %v446_v33 }
 0x304   :  { %v460_v38 = vsel %vm459_vm1, %v458_v35, %v453_v36 }
 0x305   :  { %v467_v39 = vsel %vm466_vm2, %v465_v37, %v460_v38 }
 0x306   :  { %470 = vst.msk [vmem:[#allocation3] sm:$0x1] %vm469_vm3, %v467_v39 }
 0x307   :  { %578 = shalt.err (!%p575_p4)
}
 0x308   :  { %480 = dma.vmem_to_hbm [thread:$0]  %s478_s7, 16, %s723_s9, [#allocation4]  }
 0x309   :  { %587 = dma.done.wait [#allocation4], 16  }
 0x30a   :  { %588 = vsyncadd [#allocation4], 4294967280 }
 0x30b   :  { %484 = vsyncpa [#allocation4], 1 }

</bundles_post_ra>
